<compile_context>
chip_gen: v7x
topology: tpu7x:2x2x1
jax: 0.10.0
libtpu: 0.0.40
codegen_flags: <defaults>
</compile_context>

<pallas_src>
import jax
import jax.numpy as jnp
from jax.experimental import pallas as pl
from jax.experimental.pallas import tpu as pltpu

# ----------------------------- config (small) -----------------------------
VOCAB            = 100
VOCAB_PAD        = 128                                       # pad to one lane tile / one MXU K-tile
EMBED_DIM        = 16
USER_NUM_FIELDS  = 2
ITEM_NUM_FIELDS  = 2
SN_NUM_FIELDS    = 1
NUM_FIELDS       = USER_NUM_FIELDS + ITEM_NUM_FIELDS         # x = cat(x_user, x_item) -> 4
MAX_HIST_LEN     = 8
MAX_SESSION_LEN  = 8
HIDDEN_DIMS      = (32, 16)
BATCH            = 8

H1, H2    = HIDDEN_DIMS
INPUT_DIM = NUM_FIELDS * EMBED_DIM                            # 64
HIST_DIM  = MAX_HIST_LEN * ITEM_NUM_FIELDS * EMBED_DIM        # 256
MLP_DIM   = INPUT_DIM + HIST_DIM                              # 320
NUM_SLOTS = NUM_FIELDS + MAX_HIST_LEN * ITEM_NUM_FIELDS       # 20 embedding slots feeding W1
NSV       = NUM_SLOTS * VOCAB_PAD                             # 2560
P_ROWS    = H1 + 4                                            # packed-params rows


# ------------------------------- kernel -----------------------------------
def bst_kernel(band_idx_ref, t_ref, p_ref, prob_ref):
    """band_idx: (B, NSV) int32 global one-hot positions (slot*VOCAB_PAD + token id), one band
    of VOCAB_PAD lanes per embedding slot.  t: (NSV, H1) folded emb@W1 table.  p: packed params."""
    # ---- single fused one-hot over all 20 embedding slots (x fields + history slots) ----
    col = jax.lax.broadcasted_iota(jnp.int32, band_idx_ref.shape, 1)          # (B, NSV)
    oh  = (col == band_idx_ref[...]).astype(jnp.float32)                      # exact 0/1

    # ---- packed small parameters, sliced statically ----
    P  = p_ref[...]                                                           # (P_ROWS, H1)
    w2 = P[0:H1, 0:H2]                                                        # (H1, H2)
    b1 = P[H1:H1 + 1, :]                                                      # (1, H1) pos-folded bias
    b2 = P[H1 + 1:H1 + 2, 0:H2]                                               # (1, H2)
    w3 = P[H1 + 2:H1 + 3, 0:H2]                                               # (1, H2)
    b3 = P[H1 + 3:H1 + 4, 0:1]                                                # (1, 1)

    # ---- MLP (eval mode: BatchNorm/Dropout = identity); layer 1 fused with both gathers ----
    h1 = jnp.dot(oh, t_ref[...], preferred_element_type=jnp.float32) + b1     # (B, H1)
    h1 = jnp.maximum(h1, 0.0)
    h2 = jnp.dot(h1, w2, preferred_element_type=jnp.float32) + b2             # (B, H2)
    h2 = jnp.maximum(h2, 0.0)
    # final (H2 -> 1) layer as VPU multiply + lane reduce instead of an N=1 MXU matmul
    logit = jnp.sum(h2 * w3, axis=-1, keepdims=True) + b3                     # (B, 1)

    prob_ref[...] = jax.nn.sigmoid(logit)


# ------------------------------- wrapper -----------------------------------
def bst_forward(folded, x_user, x_item, x_sn, user_hist, hist_len,
                x_session, session_len, ubr_user_hist=None, ubr_hist_len=None):
    """Mirrors BST.forward.  x_sn / hist_len / x_session / session_len / ubr_* do not affect
    the reference output and are accepted for signature fidelity only."""
    B = x_user.shape[0]

    # drop the trailing feature column, exactly like the PyTorch forward
    hist_ids = user_hist[:, :, :-1].astype(jnp.int32)                         # (B, L, F)
    hist_ids = hist_ids.reshape(B, MAX_HIST_LEN * ITEM_NUM_FIELDS)            # l-major, f-minor

    # slot-ordered indices: [x_user | x_item | history(l, f)] -> (B, NUM_SLOTS)
    idx = jnp.concatenate(
        [x_user.astype(jnp.int32), x_item.astype(jnp.int32), hist_ids], axis=1)
    # global one-hot column per slot, then broadcast over each slot's 128-lane band
    g = idx + (jnp.arange(NUM_SLOTS, dtype=jnp.int32) * VOCAB_PAD)[None, :]   # (B, NUM_SLOTS)
    band_idx = jnp.repeat(g, VOCAB_PAD, axis=1)                               # (B, NSV) index plumbing

    vmem = pl.BlockSpec(memory_space=pltpu.MemorySpace.VMEM)
    # TODO(synk): at toy batch (B=8) a single ungridded call is optimal; for serving batch sizes
    # add grid=(B//TB,) over batch rows with dimension_semantics=("parallel",) to use both v7x TCs.
    prob = pl.pallas_call(
        bst_kernel,
        out_shape=jax.ShapeDtypeStruct((B, 1), jnp.float32),
        in_specs=[vmem, vmem, vmem],
        out_specs=vmem,
    )(band_idx, folded["T"], folded["P"])

    score = None                                                              # reference returns None
    return prob[:, 0], score


# --------------------------- deterministic init -----------------------------
def init_params(key):
    """Natural (PyTorch-shaped) parameters of the BST model (eval mode)."""
    ks = jax.random.split(key, 8)
    def w(k, shape, scale=0.1):
        return (scale * jax.random.normal(k, shape)).astype(jnp.float32)
    return {
        "embedding":     w(ks[0], (VOCAB, EMBED_DIM)),
        "pos_embedding": w(ks[1], (MAX_HIST_LEN, EMBED_DIM)),
        # MLP (MLP_DIM -> 32 -> 16 -> 1); weights stored input-major (inp @ W).
        "mlp_w1": w(ks[2], (MLP_DIM, H1)),
        "mlp_b1": jnp.zeros((1, H1), jnp.float32),
        "mlp_w2": w(ks[3], (H1, H2)),
        "mlp_b2": jnp.zeros((1, H2), jnp.float32),
        "mlp_w3": w(ks[4], (1, H2)),         # final (H2 -> 1) weight stored as a row
        "mlp_b3": jnp.zeros((1, 1), jnp.float32),
    }
    # TODO(synk): torchfm-style MultiLayerPerceptron also has BatchNorm1d + Dropout; both are
    # identities in eval mode with default stats.  The reference's TransformerEncoderLayer output
    # is discarded in forward(), so its weights are not needed.


def fold_params(params):
    """One-time inference-parameter folding (valid because the transformer output is discarded):
       * pad vocab to VOCAB_PAD with zero rows,
       * T[s*VOCAB_PAD + v, :] = emb_pad[v] @ W1_slot[s]  (gather fused with layer 1),
       * position embedding folded into b1 (batch-independent linear contribution)."""
    emb_pad = jnp.zeros((VOCAB_PAD, EMBED_DIM), jnp.float32).at[:VOCAB].set(params["embedding"])
    w1_slots = params["mlp_w1"].reshape(NUM_SLOTS, EMBED_DIM, H1)             # (20, E, H1)
    T = jnp.einsum("ve,seh->svh", emb_pad, w1_slots).reshape(NSV, H1)         # (NSV, H1)

    w1_hist = w1_slots[NUM_FIELDS:].reshape(MAX_HIST_LEN, ITEM_NUM_FIELDS, EMBED_DIM, H1)
    b1_fold = params["mlp_b1"][0] + jnp.einsum("le,lfeh->h", params["pos_embedding"], w1_hist)

    P = jnp.zeros((P_ROWS, H1), jnp.float32)
    P = P.at[0:H1, 0:H2].set(params["mlp_w2"])
    P = P.at[H1, :].set(b1_fold)
    P = P.at[H1 + 1, 0:H2].set(params["mlp_b2"][0])
    P = P.at[H1 + 2, 0:H2].set(params["mlp_w3"][0])
    P = P.at[H1 + 3, 0].set(params["mlp_b3"][0, 0])
    return {"T": T, "P": P}


# --------------------------------- main -------------------------------------
if __name__ == "__main__":
    key = jax.random.PRNGKey(0)
    kp, k1, k2, k3, k4, k5, k6, k7 = jax.random.split(key, 8)

    params = init_params(kp)
    folded = fold_params(params)   # one-time prep; indices assumed in [0, VOCAB)

    x_user = jax.random.randint(k1, (BATCH, USER_NUM_FIELDS), 0, VOCAB, dtype=jnp.int32)
    x_item = jax.random.randint(k2, (BATCH, ITEM_NUM_FIELDS), 0, VOCAB, dtype=jnp.int32)
    x_sn   = jax.random.randint(k3, (BATCH, SN_NUM_FIELDS), 0, VOCAB, dtype=jnp.int32)
    # history / session carry one extra trailing feature column that forward() drops
    user_hist = jax.random.randint(
        k4, (BATCH, MAX_HIST_LEN, ITEM_NUM_FIELDS + 1), 0, VOCAB, dtype=jnp.int32)
    x_session = jax.random.randint(
        k5, (BATCH, MAX_SESSION_LEN, ITEM_NUM_FIELDS + 1), 0, VOCAB, dtype=jnp.int32)
    hist_len = jax.random.randint(k6, (BATCH,), 1, MAX_HIST_LEN + 1, dtype=jnp.int32)
    session_len = jax.random.randint(k7, (BATCH,), 1, MAX_SESSION_LEN + 1, dtype=jnp.int32)

    prob, score = jax.jit(bst_forward)(
        folded, x_user, x_item, x_sn, user_hist, hist_len, x_session, session_len)
    jax.block_until_ready(prob)

    assert prob.shape == (BATCH,)
    assert score is None
    assert bool(jnp.all(jnp.isfinite(prob)))
    assert bool(jnp.all((prob > 0.0) & (prob < 1.0)))
    print("KERNEL_OK")
</pallas_src>

<mosaic_0001>
module attributes {stable_mosaic.version = 11 : i64} {
  func.func @bst_kernel(%arg0: memref<8x2560xi32, #tpu.memory_space<vmem>>, %arg1: memref<2560x32xf32, #tpu.memory_space<vmem>>, %arg2: memref<36x32xf32, #tpu.memory_space<vmem>>, %arg3: memref<8x1xf32, #tpu.memory_space<vmem>>) attributes {dimension_semantics = [], scalar_prefetch = 0 : i64, scratch_operands = 0 : i64, tpu.core_type = #tpu.core_type<tc>} {
    %0 = tpu.iota {dimensions = array<i32: 1>} : vector<8x2560xi32>
    %c0 = arith.constant 0 : index
    %c0_0 = arith.constant 0 : index
    %1 = vector.load %arg0[%c0, %c0_0] : memref<8x2560xi32, #tpu.memory_space<vmem>>, vector<8x2560xi32>
    %2 = arith.cmpi eq, %0, %1 : vector<8x2560xi32>
    %3 = arith.extui %2 : vector<8x2560xi1> to vector<8x2560xi32>
    %4 = arith.sitofp %3 : vector<8x2560xi32> to vector<8x2560xf32>
    %c0_1 = arith.constant 0 : index
    %c0_2 = arith.constant 0 : index
    %5 = vector.load %arg2[%c0_1, %c0_2] : memref<36x32xf32, #tpu.memory_space<vmem>>, vector<36x32xf32>
    %6 = vector.extract_strided_slice %5 {offsets = [0, 0], sizes = [32, 16], strides = [1, 1]} : vector<36x32xf32> to vector<32x16xf32>
    %7 = vector.extract_strided_slice %5 {offsets = [32, 0], sizes = [1, 32], strides = [1, 1]} : vector<36x32xf32> to vector<1x32xf32>
    %8 = vector.extract_strided_slice %5 {offsets = [33, 0], sizes = [1, 16], strides = [1, 1]} : vector<36x32xf32> to vector<1x16xf32>
    %9 = vector.extract_strided_slice %5 {offsets = [34, 0], sizes = [1, 16], strides = [1, 1]} : vector<36x32xf32> to vector<1x16xf32>
    %10 = vector.extract_strided_slice %5 {offsets = [35, 0], sizes = [1, 1], strides = [1, 1]} : vector<36x32xf32> to vector<1x1xf32>
    %c0_3 = arith.constant 0 : index
    %c0_4 = arith.constant 0 : index
    %11 = vector.load %arg1[%c0_3, %c0_4] : memref<2560x32xf32, #tpu.memory_space<vmem>>, vector<2560x32xf32>
    %cst = arith.constant dense<0.000000e+00> : vector<8x32xf32>
    %12 = tpu.matmul %4, %11, %cst {dimension_numbers = #tpu.dot_dimension_numbers<[1], [0], [0], [1], [0, 0, 1, 1], [], []>} : vector<8x2560xf32>, vector<2560x32xf32>, vector<8x32xf32> -> vector<8x32xf32>
    %13 = vector.broadcast %7 : vector<1x32xf32> to vector<8x32xf32>
    %14 = arith.addf %12, %13 : vector<8x32xf32>
    %cst_5 = arith.constant 0.000000e+00 : f32
    %15 = vector.broadcast %cst_5 : f32 to vector<8x32xf32>
    %16 = arith.maximumf %14, %15 : vector<8x32xf32>
    %cst_6 = arith.constant dense<0.000000e+00> : vector<8x16xf32>
    %17 = tpu.matmul %16, %6, %cst_6 {dimension_numbers = #tpu.dot_dimension_numbers<[1], [0], [0], [1], [0, 0, 1, 1], [], []>} : vector<8x32xf32>, vector<32x16xf32>, vector<8x16xf32> -> vector<8x16xf32>
    %18 = vector.broadcast %8 : vector<1x16xf32> to vector<8x16xf32>
    %19 = arith.addf %17, %18 : vector<8x16xf32>
    %cst_7 = arith.constant 0.000000e+00 : f32
    %20 = vector.broadcast %cst_7 : f32 to vector<8x16xf32>
    %21 = arith.maximumf %19, %20 : vector<8x16xf32>
    %22 = vector.broadcast %9 : vector<1x16xf32> to vector<8x16xf32>
    %23 = arith.mulf %21, %22 : vector<8x16xf32>
    %cst_8 = arith.constant dense<0.000000e+00> : vector<8xf32>
    %24 = vector.multi_reduction <add>, %23, %cst_8 [1] : vector<8x16xf32> to vector<8xf32>
    %25 = vector.shape_cast %24 : vector<8xf32> to vector<8x1xf32>
    %26 = vector.broadcast %10 : vector<1x1xf32> to vector<8x1xf32>
    %27 = arith.addf %25, %26 : vector<8x1xf32>
    %28 = arith.negf %27 : vector<8x1xf32>
    %29 = math.exp %28 : vector<8x1xf32>
    %cst_9 = arith.constant 1.000000e+00 : f32
    %30 = vector.broadcast %cst_9 : f32 to vector<8x1xf32>
    %31 = arith.addf %30, %29 : vector<8x1xf32>
    %32 = arith.divf %30, %31 : vector<8x1xf32>
    %c0_10 = arith.constant 0 : index
    %c0_11 = arith.constant 0 : index
    %33 = vector.load %arg3[%c0_10, %c0_11] : memref<8x1xf32, #tpu.memory_space<vmem>>, vector<8x1xf32>
    tpu.vector_store %arg3[%c0_10, %c0_11], %32 {strides = array<i32>} : memref<8x1xf32, #tpu.memory_space<vmem>>, vector<8x1xf32>,
    return
  }
}

</mosaic_0001>

<bundles_post_ra>
// kernel: bst_forward.1
= control target key start
LH: loop header
LB: loop body
LE: loop exit
PB: predicated region body
PF: predicated region fallthrough
CT: control target
= control target key end

     0   :  { %v14_v47 = vlaneseq  ;;  %s3121_s1 = inlined_call_operand.vmem [shape: f32[2560,32], index: 1, kind: input, shape index: {}]   ;;  %s3122_s0 = inlined_call_operand.vmem [shape: s32[8,2560], index: 0, kind: input, shape index: {}]   ;;  %s3123_s2 = inlined_call_operand.vmem [shape: f32[36,32], index: 2, kind: input, shape index: {}]   ;;  %s3124_s3 = inlined_call_operand.vmem [shape: f32[8,1], index: 3, kind: output, shape index: {}]  }
   0x1   :  { %v136_v0 = vld [vmem:[%s3121_s1 + $0x80] sm:$0xff]  ;;  %v137_v1 = vld [vmem:[%s3121_s1 + $0x88] sm:$0xff]  ;;  %v138_v11 = vld [vmem:[%s3121_s1 + $0x90] sm:$0xff] }
   0x2   :  { %v120_v2 = vld [vmem:[%s3121_s1] sm:$0xff]  ;;  %v1658_v3 = vpack.c.bf16 %v137_v1, %v136_v0  ;;  %v121_v4 = vld [vmem:[%s3121_s1 + $0x8] sm:$0xff]  ;;  %v139_v13 = vld [vmem:[%s3121_s1 + $0x98] sm:$0xff]  ;;  %v2143_v61 = vand.u32 127, %v14_v47 }
   0x3   :  { %v168_v5 = vld [vmem:[%s3121_s1 + $0x180] sm:$0xff]  ;;  %v169_v6 = vld [vmem:[%s3121_s1 + $0x188] sm:$0xff]  ;;  %v1660_v7 = vpack.c.bf16 %v121_v4, %v120_v2  ;;  %v122_v14 = vld [vmem:[%s3121_s1 + $0x10] sm:$0xff]  ;;  %v1662_v16 = vpack.c.bf16 %v139_v13, %v138_v11 }
   0x4   :  { %v1690_v8 = vpack.c.bf16 %v169_v6, %v168_v5  ;;  %v152_v9 = vld [vmem:[%s3121_s1 + $0x100] sm:$0xff]  ;;  %v153_v10 = vld [vmem:[%s3121_s1 + $0x108] sm:$0xff]  ;;  %1659 = vmatprep.subr.bf16.mxu0 %v1658_v3  ;;  %v123_v15 = vld [vmem:[%s3121_s1 + $0x18] sm:$0xff]  ;;  %v18_v13 = vadd.s32 384, %v2143_v61 }
   0x5   :  { %v1692_v12 = vpack.c.bf16 %v153_v10, %v152_v9  ;;  %1661 = vmatpush3.bf16.msra.mxu0 %v1660_v7  ;;  %v1664_v17 = vpack.c.bf16 %v123_v15, %v122_v14  ;;  %v170_v18 = vld [vmem:[%s3121_s1 + $0x190] sm:$0xff]  ;;  %v171_v19 = vld [vmem:[%s3121_s1 + $0x198] sm:$0xff]  ;;  %v140_v23 = vld [vmem:[%s3121_s1 + $0xa0] sm:$0xff]  ;;  %v16_v10 = vadd.s32 128, %v2143_v61 }
   0x6   :  { %1691 = vmatprep.subr.bf16.mxu1 %v1690_v8  ;;  %v154_v20 = vld [vmem:[%s3121_s1 + $0x110] sm:$0xff]  ;;  %v1694_v21 = vpack.c.bf16 %v171_v19, %v170_v18  ;;  %v155_v22 = vld [vmem:[%s3121_s1 + $0x118] sm:$0xff]  ;;  %v141_v24 = vld [vmem:[%s3121_s1 + $0xa8] sm:$0xff]  ;;  %1663 = vmatprep.subr.bf16.mxu0 %v1662_v16 }
   0x7   :  { %1693 = vmatpush3.bf16.msra.mxu1 %v1692_v12  ;;  %v1696_v25 = vpack.c.bf16 %v155_v22, %v154_v20  ;;  %v1666_v26 = vpack.c.bf16 %v141_v24, %v140_v23  ;;  %v124_v27 = vld [vmem:[%s3121_s1 + $0x20] sm:$0xff]  ;;  %v125_v28 = vld [vmem:[%s3121_s1 + $0x28] sm:$0xff]  ;;  %v142_v35 = vld [vmem:[%s3121_s1 + $0xb0] sm:$0xff] }
   0x8   :  { %v172_v29 = vld [vmem:[%s3121_s1 + $0x1a0] sm:$0xff]  ;;  %1695 = vmatprep.subr.bf16.mxu1 %v1694_v21  ;;  %v173_v30 = vld [vmem:[%s3121_s1 + $0x1a8] sm:$0xff]  ;;  %v1668_v33 = vpack.c.bf16 %v125_v28, %v124_v27  ;;  %v143_v36 = vld [vmem:[%s3121_s1 + $0xb8] sm:$0xff]  ;;  %v1992_v28 = vmov 1.0  }
   0x9   :  { %v156_v31 = vld [vmem:[%s3121_s1 + $0x120] sm:$0xff]  ;;  %v157_v32 = vld [vmem:[%s3121_s1 + $0x128] sm:$0xff]  ;;  %1665 = vmatpush3.bf16.msra.mxu0 %v1664_v17  ;;  %v1698_v34 = vpack.c.bf16 %v173_v30, %v172_v29  ;;  %v126_v37 = vld [vmem:[%s3121_s1 + $0x30] sm:$0xff]  ;;  %v1670_v39 = vpack.c.bf16 %v143_v36, %v142_v35 }
   0xa   :  { %1667 = vmatprep.subr.bf16.mxu0 %v1666_v26  ;;  %v1700_v38 = vpack.c.bf16 %v157_v32, %v156_v31  ;;  %v127_v40 = vld [vmem:[%s3121_s1 + $0x38] sm:$0xff]  ;;  %v174_v41 = vld [vmem:[%s3121_s1 + $0x1b0] sm:$0xff]  ;;  %v144_v46 = vld [vmem:[%s3121_s1 + $0xc0] sm:$0xff] }
   0xb   :  { %1697 = vmatpush3.bf16.msra.mxu1 %v1696_v25  ;;  %v175_v42 = vld [vmem:[%s3121_s1 + $0x1b8] sm:$0xff]  ;;  %v158_v44 = vld [vmem:[%s3121_s1 + $0x130] sm:$0xff]  ;;  %v145_v48 = vld [vmem:[%s3121_s1 + $0xc8] sm:$0xff]  ;;  %v1672_v49 = vpack.c.bf16 %v127_v40, %v126_v37 }
   0xc   :  { %1699 = vmatprep.subr.bf16.mxu1 %v1698_v34  ;;  %v1702_v43 = vpack.c.bf16 %v175_v42, %v174_v41  ;;  %v159_v45 = vld [vmem:[%s3121_s1 + $0x138] sm:$0xff]  ;;  %v176_v50 = vld [vmem:[%s3121_s1 + $0x1c0] sm:$0xff]  ;;  %v177_v51 = vld [vmem:[%s3121_s1 + $0x1c8] sm:$0xff]  ;;  %v1674_v53 = vpack.c.bf16 %v145_v48, %v144_v46  ;;  %v17_v48 = vadd.s32 256, %v2143_v61 }
   0xd   :  { %1669 = vmatpush3.bf16.msra.mxu0 %v1668_v33  ;;  %v1704_v52 = vpack.c.bf16 %v159_v45, %v158_v44  ;;  %v128_v54 = vld [vmem:[%s3121_s1 + $0x40] sm:$0xff]  ;;  %v129_v55 = vld [vmem:[%s3121_s1 + $0x48] sm:$0xff]  ;;  %v1706_v57 = vpack.c.bf16 %v177_v51, %v176_v50  ;;  %v146_v59 = vld [vmem:[%s3121_s1 + $0xd0] sm:$0xff] }
   0xe   :  { %1671 = vmatprep.subr.bf16.mxu0 %v1670_v39  ;;  %v160_v56 = vld [vmem:[%s3121_s1 + $0x140] sm:$0xff]  ;;  %v161_v58 = vld [vmem:[%s3121_s1 + $0x148] sm:$0xff]  ;;  %v147_v60 = vld [vmem:[%s3121_s1 + $0xd8] sm:$0xff]  ;;  %v1676_v0 = vpack.c.bf16 %v129_v55, %v128_v54 }
   0xf   :  { %1701 = vmatpush3.bf16.msra.mxu1 %v1700_v38  ;;  %v178_v62 = vld [vmem:[%s3121_s1 + $0x1d0] sm:$0xff]  ;;  %v179_v63 = vld [vmem:[%s3121_s1 + $0x1d8] sm:$0xff]  ;;  %v1708_v1 = vpack.c.bf16 %v161_v58, %v160_v56  ;;  %v1678_v2 = vpack.c.bf16 %v147_v60, %v146_v59  ;;  %v148_v8 = vld [vmem:[%s3121_s1 + $0xe0] sm:$0xff] }
  0x10   :  { %1703 = vmatprep.subr.bf16.mxu1 %v1702_v43  ;;  %v130_v3 = vld [vmem:[%s3121_s1 + $0x50] sm:$0xff]  ;;  %v131_v4 = vld [vmem:[%s3121_s1 + $0x58] sm:$0xff]  ;;  %v1710_v6 = vpack.c.bf16 %v179_v63, %v178_v62  ;;  %v149_v9 = vld [vmem:[%s3121_s1 + $0xe8] sm:$0xff] }
  0x11   :  { %1673 = vmatpush3.bf16.msra.mxu0 %v1672_v49  ;;  %v162_v5 = vld [vmem:[%s3121_s1 + $0x150] sm:$0xff]  ;;  %v163_v7 = vld [vmem:[%s3121_s1 + $0x158] sm:$0xff]  ;;  %v180_v11 = vld [vmem:[%s3121_s1 + $0x1e0] sm:$0xff]  ;;  %v1680_v14 = vpack.c.bf16 %v131_v4, %v130_v3  ;;  %v1682_v18 = vpack.c.bf16 %v149_v9, %v148_v8 }
  0x12   :  { %1675 = vmatprep.subr.bf16.mxu0 %v1674_v53  ;;  %v181_v12 = vld [vmem:[%s3121_s1 + $0x1e8] sm:$0xff]  ;;  %v132_v15 = vld [vmem:[%s3121_s1 + $0x60] sm:$0xff]  ;;  %v1712_v17 = vpack.c.bf16 %v163_v7, %v162_v5  ;;  %v150_v23 = vld [vmem:[%s3121_s1 + $0xf0] sm:$0xff] }
  0x13   :  { %1705 = vmatpush3.bf16.msra.mxu1 %v1704_v52  ;;  %v133_v16 = vld [vmem:[%s3121_s1 + $0x68] sm:$0xff]  ;;  %v164_v19 = vld [vmem:[%s3121_s1 + $0x160] sm:$0xff]  ;;  %v1714_v22 = vpack.c.bf16 %v181_v12, %v180_v11  ;;  %v151_v24 = vld [vmem:[%s3121_s1 + $0xf8] sm:$0xff] }
  0x14   :  { %1707 = vmatprep.subr.bf16.mxu1 %v1706_v57  ;;  %v165_v20 = vld [vmem:[%s3121_s1 + $0x168] sm:$0xff]  ;;  %v38_v25 = vld [vmem:[%s3122_s0 + $0x18] sm:$0xff]  ;;  %v182_v26 = vld [vmem:[%s3121_s1 + $0x1f0] sm:$0xff]  ;;  %v1684_v29 = vpack.c.bf16 %v133_v16, %v132_v15  ;;  %v1686_v31 = vpack.c.bf16 %v151_v24, %v150_v23  ;;  %v20_v24 = vadd.s32 640, %v2143_v61 }
  0x15   :  { %1677 = vmatpush3.bf16.msra.mxu0 %v1676_v0  ;;  %v36_v21 = vld [vmem:[%s3122_s0 + $0x8] sm:$0xff]  ;;  %v183_v27 = vld [vmem:[%s3121_s1 + $0x1f8] sm:$0xff]  ;;  %vm58_vm1 = vcmp.eq.s32.totalorder %v18_v13, %v38_v25  ;;  %v1716_v30 = vpack.c.bf16 %v165_v20, %v164_v19  ;;  %v134_v32 = vld [vmem:[%s3121_s1 + $0x70] sm:$0xff] }
  0x16   :  { %1679 = vmatprep.subr.bf16.mxu0 %v1678_v2  ;;  %vm56_vm0 = vcmp.eq.s32.totalorder %v16_v10, %v36_v21  ;;  %1272 = vmatprep.mubr.msk.f32.mxu1 %vm58_vm1, %v1992_v28  ;;  %v135_v33 = vld [vmem:[%s3121_s1 + $0x78] sm:$0xff]  ;;  %v166_v34 = vld [vmem:[%s3121_s1 + $0x170] sm:$0xff]  ;;  %v1718_v35 = vpack.c.bf16 %v183_v27, %v182_v26  ;;  %v200_v37 = vld [vmem:[%s3121_s1 + $0x280] sm:$0xff] }
  0x17   :  { %1709 = vmatpush3.bf16.msra.mxu1 %v1708_v1  ;;  %1270 = vmatprep.mubr.msk.f32.mxu0 %vm56_vm0, %v1992_v28  ;;  %v167_v36 = vld [vmem:[%s3121_s1 + $0x178] sm:$0xff]  ;;  %v201_v38 = vld [vmem:[%s3121_s1 + $0x288] sm:$0xff]  ;;  %v232_v39 = vld [vmem:[%s3121_s1 + $0x380] sm:$0xff]  ;;  %v1688_v41 = vpack.c.bf16 %v135_v33, %v134_v32 }
  0x18   :  { %1711 = vmatprep.subr.bf16.mxu1 %v1710_v6  ;;  %v233_v40 = vld [vmem:[%s3121_s1 + $0x388] sm:$0xff]  ;;  %v35_v42 = vld [vmem:[%s3122_s0] sm:$0xff]  ;;  %v1720_v44 = vpack.c.bf16 %v167_v36, %v166_v34  ;;  %v1722_v45 = vpack.c.bf16 %v201_v38, %v200_v37  ;;  %v37_v49 = vld [vmem:[%s3122_s0 + $0x10] sm:$0xff] }
  0x19   :  { %1681 = vmatpush3.bf16.msra.mxu0 %v1680_v14  ;;  %v184_v43 = vld [vmem:[%s3121_s1 + $0x200] sm:$0xff]  ;;  %v185_v46 = vld [vmem:[%s3121_s1 + $0x208] sm:$0xff]  ;;  %v1754_v51 = vpack.c.bf16 %v233_v40, %v232_v39  ;;  %v202_v53 = vld [vmem:[%s3121_s1 + $0x290] sm:$0xff]  ;;  %vm55_vm2 = vcmp.eq.s32.totalorder %v2143_v61, %v35_v42  ;;  %vm57_vm3 = vcmp.eq.s32.totalorder %v17_v48, %v37_v49 }
  0x1a   :  { %1683 = vmatprep.subr.bf16.mxu0 %v1682_v18  ;;  %v216_v50 = vld [vmem:[%s3121_s1 + $0x300] sm:$0xff]  ;;  %v217_v52 = vld [vmem:[%s3121_s1 + $0x308] sm:$0xff]  ;;  %v203_v54 = vld [vmem:[%s3121_s1 + $0x298] sm:$0xff]  ;;  %v1724_v57 = vpack.c.bf16 %v185_v46, %v184_v43 }
  0x1b   :  { %1713 = vmatpush3.bf16.msra.mxu1 %v1712_v17  ;;  %v234_v55 = vld [vmem:[%s3121_s1 + $0x390] sm:$0xff]  ;;  %v235_v56 = vld [vmem:[%s3121_s1 + $0x398] sm:$0xff]  ;;  %v1756_v58 = vpack.c.bf16 %v217_v52, %v216_v50  ;;  %v1726_v59 = vpack.c.bf16 %v203_v54, %v202_v53  ;;  %v204_v2 = vld [vmem:[%s3121_s1 + $0x2a0] sm:$0xff] }
  0x1c   :  { %1715 = vmatprep.subr.bf16.mxu1 %v1714_v22  ;;  %v186_v60 = vld [vmem:[%s3121_s1 + $0x210] sm:$0xff]  ;;  %v187_v62 = vld [vmem:[%s3121_s1 + $0x218] sm:$0xff]  ;;  %v1758_v0 = vpack.c.bf16 %v235_v56, %v234_v55  ;;  %v205_v3 = vld [vmem:[%s3121_s1 + $0x2a8] sm:$0xff] }
  0x1d   :  { %1685 = vmatpush3.bf16.msra.mxu0 %v1684_v29  ;;  %v218_v63 = vld [vmem:[%s3121_s1 + $0x310] sm:$0xff]  ;;  %v219_v1 = vld [vmem:[%s3121_s1 + $0x318] sm:$0xff]  ;;  %v236_v4 = vld [vmem:[%s3121_s1 + $0x3a0] sm:$0xff]  ;;  %v1728_v6 = vpack.c.bf16 %v187_v62, %v186_v60  ;;  %v1730_v8 = vpack.c.bf16 %v205_v3, %v204_v2 }
  0x1e   :  { %1687 = vmatprep.subr.bf16.mxu0 %v1686_v31  ;;  %v237_v5 = vld [vmem:[%s3121_s1 + $0x3a8] sm:$0xff]  ;;  %v1760_v7 = vpack.c.bf16 %v219_v1, %v218_v63  ;;  %v188_v9 = vld [vmem:[%s3121_s1 + $0x220] sm:$0xff]  ;;  %v206_v14 = vld [vmem:[%s3121_s1 + $0x2b0] sm:$0xff] }
  0x1f   :  { %1717 = vmatpush3.bf16.msra.mxu1 %v1716_v30  ;;  %v189_v10 = vld [vmem:[%s3121_s1 + $0x228] sm:$0xff]  ;;  %v220_v11 = vld [vmem:[%s3121_s1 + $0x320] sm:$0xff]  ;;  %v1762_v12 = vpack.c.bf16 %v237_v5, %v236_v4  ;;  %v207_v15 = vld [vmem:[%s3121_s1 + $0x2b8] sm:$0xff]  ;;  %v22_v30 = vadd.s32 896, %v2143_v61 }
  0x20   :  { %1719 = vmatprep.subr.bf16.mxu1 %v1718_v35  ;;  %v221_v13 = vld [vmem:[%s3121_s1 + $0x328] sm:$0xff]  ;;  %v238_v16 = vld [vmem:[%s3121_s1 + $0x3b0] sm:$0xff]  ;;  %v239_v17 = vld [vmem:[%s3121_s1 + $0x3b8] sm:$0xff]  ;;  %v1732_v18 = vpack.c.bf16 %v189_v10, %v188_v9  ;;  %v1734_v20 = vpack.c.bf16 %v207_v15, %v206_v14 }
  0x21   :  { %1689 = vmatpush3.bf16.msra.mxu0 %v1688_v41  ;;  %v1764_v19 = vpack.c.bf16 %v221_v13, %v220_v11  ;;  %v190_v21 = vld [vmem:[%s3121_s1 + $0x230] sm:$0xff]  ;;  %v191_v22 = vld [vmem:[%s3121_s1 + $0x238] sm:$0xff]  ;;  %v1766_v25 = vpack.c.bf16 %v239_v17, %v238_v16  ;;  %v208_v27 = vld [vmem:[%s3121_s1 + $0x2c0] sm:$0xff] }
  0x22   :  { %1723 = vmatprep.subr.bf16.mxu0 %v1722_v45  ;;  %v222_v23 = vld [vmem:[%s3121_s1 + $0x330] sm:$0xff]  ;;  %v223_v26 = vld [vmem:[%s3121_s1 + $0x338] sm:$0xff]  ;;  %v209_v29 = vld [vmem:[%s3121_s1 + $0x2c8] sm:$0xff]  ;;  %v1736_v33 = vpack.c.bf16 %v191_v22, %v190_v21  ;;  %v19_v22 = vadd.s32 512, %v2143_v61 }
  0x23   :  { %1721 = vmatpush3.bf16.msra.mxu1 %v1720_v44  ;;  %v240_v31 = vld [vmem:[%s3121_s1 + $0x3c0] sm:$0xff]  ;;  %v241_v32 = vld [vmem:[%s3121_s1 + $0x3c8] sm:$0xff]  ;;  %v1768_v36 = vpack.c.bf16 %v223_v26, %v222_v23  ;;  %v1738_v37 = vpack.c.bf16 %v209_v29, %v208_v27  ;;  %v42_v40 = vld [vmem:[%s3122_s0 + $0x38] sm:$0xff]  ;;  %v21_v29 = vadd.s32 768, %v2143_v61 }
  0x24   :  { %1755 = vmatprep.subr.bf16.mxu1 %v1754_v51  ;;  %1271 = vmatmul.mubr.msk.f32.vlgmr.msra.gmra.mrb[0].mxu0 %vm55_vm2, %v1992_v28  ;;  %v192_v34 = vld [vmem:[%s3121_s1 + $0x240] sm:$0xff]  ;;  %v40_v35 = vld [vmem:[%s3122_s0 + $0x28] sm:$0xff]  ;;  %v1770_v41 = vpack.c.bf16 %v241_v32, %v240_v31  ;;  %v210_v43 = vld [vmem:[%s3121_s1 + $0x2d0] sm:$0xff]  ;;  %vm62_vm5 = vcmp.eq.s32.totalorder %v22_v30, %v42_v40 }
  0x25   :  { %1725 = vmatpush3.bf16.msra.mxu0 %v1724_v57  ;;  %v193_v38 = vld [vmem:[%s3121_s1 + $0x248] sm:$0xff]  ;;  %v224_v39 = vld [vmem:[%s3121_s1 + $0x340] sm:$0xff]  ;;  %vm60_vm4 = vcmp.eq.s32.totalorder %v20_v24, %v40_v35  ;;  %v211_v44 = vld [vmem:[%s3121_s1 + $0x2d8] sm:$0xff] }
  0x26   :  { %1273 = vmatmul.mubr.msk.f32.vlgmr.msra.gmra.mrb[0].mxu1 %vm57_vm3, %v1992_v28  ;;  %1727 = vmatprep.subr.bf16.mxu0 %v1726_v59  ;;  %v225_v42 = vld [vmem:[%s3121_s1 + $0x348] sm:$0xff]  ;;  %v242_v45 = vld [vmem:[%s3121_s1 + $0x3d0] sm:$0xff]  ;;  %v243_v46 = vld [vmem:[%s3121_s1 + $0x3d8] sm:$0xff]  ;;  %v1740_v48 = vpack.c.bf16 %v193_v38, %v192_v34  ;;  %v1742_v50 = vpack.c.bf16 %v211_v44, %v210_v43  ;;  %v24_v38 = vadd.s32 1152, %v2143_v61 }
  0x27   :  { %1757 = vmatpush3.bf16.msra.mxu1 %v1756_v58  ;;  %1274 = vmatprep.mubr.msk.f32.mxu0 %vm60_vm4, %v1992_v28  ;;  %v1772_v49 = vpack.c.bf16 %v225_v42, %v224_v39  ;;  %v194_v51 = vld [vmem:[%s3121_s1 + $0x250] sm:$0xff]  ;;  %v195_v52 = vld [vmem:[%s3121_s1 + $0x258] sm:$0xff]  ;;  %v1774_v54 = vpack.c.bf16 %v243_v46, %v242_v45  ;;  %v212_v56 = vld [vmem:[%s3121_s1 + $0x2e0] sm:$0xff]  ;;  %v26_v46 = vadd.s32 1408, %v2143_v61  ;;  %vm1994_vm4 = vmmov 0  }
  0x28   :  { %1759 = vmatprep.subr.bf16.mxu1 %v1758_v0  ;;  %1276 = vmatprep.mubr.msk.f32.mxu1 %vm62_vm5, %v1992_v28  ;;  %v226_v53 = vld [vmem:[%s3121_s1 + $0x350] sm:$0xff]  ;;  %v227_v55 = vld [vmem:[%s3121_s1 + $0x358] sm:$0xff]  ;;  %v213_v57 = vld [vmem:[%s3121_s1 + $0x2e8] sm:$0xff]  ;;  %v1744_v60 = vpack.c.bf16 %v195_v52, %v194_v51  ;;  %vm1149_vm5 = vcmask 261120  }
  0x29   :  { %1729 = vmatpush3.bf16.msra.mxu0 %v1728_v6  ;;  %v244_v58 = vld [vmem:[%s3121_s1 + $0x3e0] sm:$0xff]  ;;  %v245_v59 = vld [vmem:[%s3121_s1 + $0x3e8] sm:$0xff]  ;;  %v1776_v62 = vpack.c.bf16 %v227_v55, %v226_v53  ;;  %v1746_v63 = vpack.c.bf16 %v213_v57, %v212_v56  ;;  %v214_v5 = vld [vmem:[%s3121_s1 + $0x2f0] sm:$0xff] }
  0x2a   :  { %1731 = vmatprep.subr.bf16.mxu0 %v1730_v8  ;;  %v196_v0 = vld [vmem:[%s3121_s1 + $0x260] sm:$0xff]  ;;  %v197_v1 = vld [vmem:[%s3121_s1 + $0x268] sm:$0xff]  ;;  %v1778_v3 = vpack.c.bf16 %v245_v59, %v244_v58  ;;  %v215_v6 = vld [vmem:[%s3121_s1 + $0x2f8] sm:$0xff] }
  0x2b   :  { %1761 = vmatpush3.bf16.msra.mxu1 %v1760_v7  ;;  %v228_v2 = vld [vmem:[%s3121_s1 + $0x360] sm:$0xff]  ;;  %v229_v4 = vld [vmem:[%s3121_s1 + $0x368] sm:$0xff]  ;;  %v246_v7 = vld [vmem:[%s3121_s1 + $0x3f0] sm:$0xff]  ;;  %v1748_v9 = vpack.c.bf16 %v197_v1, %v196_v0  ;;  %v1750_v11 = vpack.c.bf16 %v215_v6, %v214_v5 }
  0x2c   :  { %1763 = vmatprep.subr.bf16.mxu1 %v1762_v12  ;;  %v247_v8 = vld [vmem:[%s3121_s1 + $0x3f8] sm:$0xff]  ;;  %v1780_v10 = vpack.c.bf16 %v229_v4, %v228_v2  ;;  %v198_v12 = vld [vmem:[%s3121_s1 + $0x270] sm:$0xff]  ;;  %v264_v17 = vld [vmem:[%s3121_s1 + $0x480] sm:$0xff] }
  0x2d   :  { %1733 = vmatpush3.bf16.msra.mxu0 %v1732_v18  ;;  %v199_v13 = vld [vmem:[%s3121_s1 + $0x278] sm:$0xff]  ;;  %v230_v14 = vld [vmem:[%s3121_s1 + $0x370] sm:$0xff]  ;;  %v1782_v15 = vpack.c.bf16 %v247_v8, %v246_v7  ;;  %v265_v18 = vld [vmem:[%s3121_s1 + $0x488] sm:$0xff] }
  0x2e   :  { %1735 = vmatprep.subr.bf16.mxu0 %v1734_v20  ;;  %v231_v16 = vld [vmem:[%s3121_s1 + $0x378] sm:$0xff]  ;;  %v297_v20 = vld [vmem:[%s3121_s1 + $0x588] sm:$0xff]  ;;  %v1752_v21 = vpack.c.bf16 %v199_v13, %v198_v12  ;;  %v39_v23 = vld [vmem:[%s3122_s0 + $0x20] sm:$0xff]  ;;  %v1786_v26 = vpack.c.bf16 %v265_v18, %v264_v17 }
  0x2f   :  { %1765 = vmatpush3.bf16.msra.mxu1 %v1764_v19  ;;  %v296_v19 = vld [vmem:[%s3121_s1 + $0x580] sm:$0xff]  ;;  %v249_v27 = vld [vmem:[%s3121_s1 + $0x408] sm:$0xff]  ;;  %v41_v30 = vld [vmem:[%s3122_s0 + $0x30] sm:$0xff]  ;;  %vm59_vm6 = vcmp.eq.s32.totalorder %v19_v22, %v39_v23 }
  0x30   :  { %1767 = vmatprep.subr.bf16.mxu1 %v1766_v25  ;;  %v248_v24 = vld [vmem:[%s3121_s1 + $0x400] sm:$0xff]  ;;  %v1784_v25 = vpack.c.bf16 %v231_v16, %v230_v14  ;;  %v1818_v32 = vpack.c.bf16 %v297_v20, %v296_v19  ;;  %v266_v34 = vld [vmem:[%s3121_s1 + $0x490] sm:$0xff]  ;;  %v267_v35 = vld [vmem:[%s3121_s1 + $0x498] sm:$0xff]  ;;  %vm61_vm7 = vcmp.eq.s32.totalorder %v21_v29, %v41_v30 }
  0x31   :  { %1737 = vmatpush3.bf16.msra.mxu0 %v1736_v33  ;;  %v280_v31 = vld [vmem:[%s3121_s1 + $0x500] sm:$0xff]  ;;  %v281_v33 = vld [vmem:[%s3121_s1 + $0x508] sm:$0xff]  ;;  %v1788_v39 = vpack.c.bf16 %v249_v27, %v248_v24  ;;  %v250_v40 = vld [vmem:[%s3121_s1 + $0x410] sm:$0xff]  ;;  %v1790_v42 = vpack.c.bf16 %v267_v35, %v266_v34 }
  0x32   :  { %1739 = vmatprep.subr.bf16.mxu0 %v1738_v37  ;;  %v299_v37 = vld [vmem:[%s3121_s1 + $0x598] sm:$0xff]  ;;  %v282_v44 = vld [vmem:[%s3121_s1 + $0x510] sm:$0xff]  ;;  %v44_v51 = vld [vmem:[%s3122_s0 + $0x48] sm:$0xff] }
  0x33   :  { %1769 = vmatpush3.bf16.msra.mxu1 %v1768_v36  ;;  %v298_v36 = vld [vmem:[%s3121_s1 + $0x590] sm:$0xff]  ;;  %v251_v43 = vld [vmem:[%s3121_s1 + $0x418] sm:$0xff]  ;;  %v300_v52 = vld [vmem:[%s3121_s1 + $0x5a0] sm:$0xff]  ;;  %vm64_vm8 = vcmp.eq.s32.totalorder %v24_v38, %v44_v51 }
  0x34   :  { %1771 = vmatprep.subr.bf16.mxu1 %v1770_v41  ;;  %v1820_v41 = vpack.c.bf16 %v281_v33, %v280_v31  ;;  %v283_v45 = vld [vmem:[%s3121_s1 + $0x518] sm:$0xff]  ;;  %v301_v53 = vld [vmem:[%s3121_s1 + $0x5a8] sm:$0xff]  ;;  %v252_v58 = vld [vmem:[%s3121_s1 + $0x420] sm:$0xff] }
  0x35   :  { %1741 = vmatpush3.bf16.msra.mxu0 %v1740_v48  ;;  %v1822_v48 = vpack.c.bf16 %v299_v37, %v298_v36  ;;  %v46_v55 = vld [vmem:[%s3122_s0 + $0x58] sm:$0xff]  ;;  %v1824_v56 = vpack.c.bf16 %v283_v45, %v282_v44  ;;  %v253_v59 = vld [vmem:[%s3121_s1 + $0x428] sm:$0xff]  ;;  %v270_v0 = vld [vmem:[%s3121_s1 + $0x4b0] sm:$0xff] }
  0x36   :  { %1743 = vmatprep.subr.bf16.mxu0 %v1742_v50  ;;  %v269_v50 = vld [vmem:[%s3121_s1 + $0x4a8] sm:$0xff]  ;;  %vm66_vm9 = vcmp.eq.s32.totalorder %v26_v46, %v46_v55  ;;  %v271_v1 = vld [vmem:[%s3121_s1 + $0x4b8] sm:$0xff]  ;;  %v302_v2 = vld [vmem:[%s3121_s1 + $0x5b0] sm:$0xff]  ;;  %v1796_v4 = vpack.c.bf16 %v253_v59, %v252_v58 }
  0x37   :  { %1773 = vmatpush3.bf16.msra.mxu1 %v1772_v49  ;;  %v268_v49 = vld [vmem:[%s3121_s1 + $0x4a0] sm:$0xff]  ;;  %v1798_v6 = vpack.c.bf16 %v271_v1, %v270_v0  ;;  %v254_v7 = vld [vmem:[%s3121_s1 + $0x430] sm:$0xff]  ;;  %v255_v8 = vld [vmem:[%s3121_s1 + $0x438] sm:$0xff] }
  0x38   :  { %1775 = vmatprep.subr.bf16.mxu1 %v1774_v54  ;;  %v1792_v54 = vpack.c.bf16 %v251_v43, %v250_v40  ;;  %v1794_v57 = vpack.c.bf16 %v269_v50, %v268_v49  ;;  %v272_v12 = vld [vmem:[%s3121_s1 + $0x4c0] sm:$0xff]  ;;  %v273_v13 = vld [vmem:[%s3121_s1 + $0x4c8] sm:$0xff]  ;;  %v1800_v16 = vpack.c.bf16 %v255_v8, %v254_v7  ;;  %v274_v24 = vld [vmem:[%s3121_s1 + $0x4d0] sm:$0xff] }
  0x39   :  { %1745 = vmatpush3.bf16.msra.mxu0 %v1744_v60  ;;  %v284_v60 = vld [vmem:[%s3121_s1 + $0x520] sm:$0xff]  ;;  %v1802_v18 = vpack.c.bf16 %v273_v13, %v272_v12  ;;  %v257_v20 = vld [vmem:[%s3121_s1 + $0x448] sm:$0xff]  ;;  %v307_v27 = vld [vmem:[%s3121_s1 + $0x5d8] sm:$0xff] }
  0x3a   :  { %1747 = vmatprep.subr.bf16.mxu0 %v1746_v63  ;;  %v285_v63 = vld [vmem:[%s3121_s1 + $0x528] sm:$0xff]  ;;  %v304_v14 = vld [vmem:[%s3121_s1 + $0x5c0] sm:$0xff]  ;;  %v259_v33 = vld [vmem:[%s3121_s1 + $0x458] sm:$0xff] }
  0x3b   :  { %1777 = vmatpush3.bf16.msra.mxu1 %v1776_v62  ;;  %v1826_v62 = vpack.c.bf16 %v301_v53, %v300_v52  ;;  %v1828_v5 = vpack.c.bf16 %v285_v63, %v284_v60  ;;  %v256_v19 = vld [vmem:[%s3121_s1 + $0x440] sm:$0xff]  ;;  %v289_v23 = vld [vmem:[%s3121_s1 + $0x548] sm:$0xff]  ;;  %v290_v34 = vld [vmem:[%s3121_s1 + $0x550] sm:$0xff] }
  0x3c   :  { %1779 = vmatprep.subr.bf16.mxu1 %v1778_v3  ;;  %v303_v3 = vld [vmem:[%s3121_s1 + $0x5b8] sm:$0xff]  ;;  %v1804_v29 = vpack.c.bf16 %v257_v20, %v256_v19  ;;  %v276_v37 = vld [vmem:[%s3121_s1 + $0x4e0] sm:$0xff]  ;;  %v277_v38 = vld [vmem:[%s3121_s1 + $0x4e8] sm:$0xff]  ;;  %v28_v19 = vadd.s32 1664, %v2143_v61 }
  0x3d   :  { %1749 = vmatpush3.bf16.msra.mxu0 %v1748_v9  ;;  %v286_v9 = vld [vmem:[%s3121_s1 + $0x530] sm:$0xff]  ;;  %v291_v36 = vld [vmem:[%s3121_s1 + $0x558] sm:$0xff]  ;;  %v309_v40 = vld [vmem:[%s3121_s1 + $0x5e8] sm:$0xff]  ;;  %v1810_v43 = vpack.c.bf16 %v277_v38, %v276_v37 }
  0x3e   :  { %1751 = vmatprep.subr.bf16.mxu0 %v1750_v11  ;;  %v287_v11 = vld [vmem:[%s3121_s1 + $0x538] sm:$0xff]  ;;  %v260_v44 = vld [vmem:[%s3121_s1 + $0x460] sm:$0xff]  ;;  %v261_v45 = vld [vmem:[%s3121_s1 + $0x468] sm:$0xff] }
  0x3f   :  { %1781 = vmatpush3.bf16.msra.mxu1 %v1780_v10  ;;  %v1830_v10 = vpack.c.bf16 %v303_v3, %v302_v2  ;;  %v1832_v17 = vpack.c.bf16 %v287_v11, %v286_v9  ;;  %v292_v46 = vld [vmem:[%s3121_s1 + $0x560] sm:$0xff]  ;;  %v293_v49 = vld [vmem:[%s3121_s1 + $0x568] sm:$0xff]  ;;  %v278_v50 = vld [vmem:[%s3121_s1 + $0x4f0] sm:$0xff] }
  0x40   :  { %1783 = vmatprep.subr.bf16.mxu1 %v1782_v15  ;;  %v305_v15 = vld [vmem:[%s3121_s1 + $0x5c8] sm:$0xff]  ;;  %v279_v51 = vld [vmem:[%s3121_s1 + $0x4f8] sm:$0xff]  ;;  %v310_v52 = vld [vmem:[%s3121_s1 + $0x5f0] sm:$0xff]  ;;  %v1844_v55 = vpack.c.bf16 %v293_v49, %v292_v46 }
  0x41   :  { %1753 = vmatpush3.bf16.msra.mxu0 %v1752_v21  ;;  %v288_v21 = vld [vmem:[%s3121_s1 + $0x540] sm:$0xff]  ;;  %v1834_v22 = vpack.c.bf16 %v305_v15, %v304_v14  ;;  %v311_v53 = vld [vmem:[%s3121_s1 + $0x5f8] sm:$0xff]  ;;  %v294_v59 = vld [vmem:[%s3121_s1 + $0x570] sm:$0xff] }
  0x42   :  { %1787 = vmatprep.subr.bf16.mxu0 %v1786_v26  ;;  %v306_v26 = vld [vmem:[%s3121_s1 + $0x5d0] sm:$0xff]  ;;  %v1836_v30 = vpack.c.bf16 %v289_v23, %v288_v21  ;;  %v263_v58 = vld [vmem:[%s3121_s1 + $0x478] sm:$0xff]  ;;  %v1846_v60 = vpack.c.bf16 %v311_v53, %v310_v52  ;;  %v328_v63 = vld [vmem:[%s3121_s1 + $0x680] sm:$0xff]  ;;  %v30_v23 = vadd.s32 1920, %v2143_v61 }
  0x43   :  { %1785 = vmatpush3.bf16.msra.mxu1 %v1784_v25  ;;  %v275_v25 = vld [vmem:[%s3121_s1 + $0x4d8] sm:$0xff]  ;;  %v1838_v35 = vpack.c.bf16 %v307_v27, %v306_v26  ;;  %v329_v0 = vld [vmem:[%s3121_s1 + $0x688] sm:$0xff]  ;;  %v360_v1 = vld [vmem:[%s3121_s1 + $0x780] sm:$0xff] }
  0x44   :  { %1819 = vmatprep.subr.bf16.mxu1 %v1818_v32  ;;  %1275 = vmatmul.mubr.msk.f32.vlgmr.msra.gmra.mrb[2].mxu0 %vm59_vm6, %v1992_v28  ;;  %v1806_v31 = vpack.c.bf16 %v275_v25, %v274_v24  ;;  %v258_v32 = vld [vmem:[%s3121_s1 + $0x450] sm:$0xff]  ;;  %v361_v2 = vld [vmem:[%s3121_s1 + $0x788] sm:$0xff]  ;;  %v1850_v8 = vpack.c.bf16 %v329_v0, %v328_v63  ;;  %v344_v12 = vld [vmem:[%s3121_s1 + $0x700] sm:$0xff]  ;;  %vm1229_vm6 = vcmask 130048  }
  0x45   :  { %1789 = vmatpush3.bf16.msra.mxu0 %v1788_v39  ;;  %1278 = vmatprep.mubr.msk.f32.mxu0 %vm64_vm8, %v1992_v28  ;;  %v308_v39 = vld [vmem:[%s3121_s1 + $0x5e0] sm:$0xff]  ;;  %v313_v9 = vld [vmem:[%s3121_s1 + $0x608] sm:$0xff]  ;;  %v45_v11 = vld [vmem:[%s3122_s0 + $0x50] sm:$0xff]  ;;  %v1882_v13 = vpack.c.bf16 %v361_v2, %v360_v1 }
  0x46   :  { %1277 = vmatmul.mubr.msk.f32.vlgmr.msra.gmra.mrb[2].mxu1 %vm61_vm7, %v1992_v28  ;;  %1791 = vmatprep.subr.bf16.mxu0 %v1790_v42  ;;  %v1840_v42 = vpack.c.bf16 %v291_v36, %v290_v34  ;;  %v345_v14 = vld [vmem:[%s3121_s1 + $0x708] sm:$0xff]  ;;  %v330_v15 = vld [vmem:[%s3121_s1 + $0x690] sm:$0xff]  ;;  %v315_v26 = vld [vmem:[%s3121_s1 + $0x618] sm:$0xff]  ;;  %vm1244_vm7 = vcmask 7168  }
  0x47   :  { %1821 = vmatpush3.bf16.msra.mxu1 %v1820_v41  ;;  %1280 = vmatprep.mubr.msk.f32.mxu1 %vm66_vm9, %v1992_v28  ;;  %v1808_v41 = vpack.c.bf16 %v259_v33, %v258_v32  ;;  %v314_v21 = vld [vmem:[%s3121_s1 + $0x610] sm:$0xff]  ;;  %v1884_v24 = vpack.c.bf16 %v345_v14, %v344_v12  ;;  %v332_v32 = vld [vmem:[%s3121_s1 + $0x6a0] sm:$0xff]  ;;  %v333_v33 = vld [vmem:[%s3121_s1 + $0x6a8] sm:$0xff] }
  0x48   :  { %1823 = vmatprep.subr.bf16.mxu1 %v1822_v48  ;;  %v1842_v48 = vpack.c.bf16 %v309_v40, %v308_v39  ;;  %v346_v27 = vld [vmem:[%s3121_s1 + $0x710] sm:$0xff]  ;;  %v364_v34 = vld [vmem:[%s3121_s1 + $0x7a0] sm:$0xff]  ;;  %v1856_v36 = vpack.c.bf16 %v315_v26, %v314_v21  ;;  %v1858_v38 = vpack.c.bf16 %v333_v33, %v332_v32  ;;  %v317_v40 = vld [vmem:[%s3121_s1 + $0x628] sm:$0xff] }
  0x49   :  { %1793 = vmatpush3.bf16.msra.mxu0 %v1792_v54  ;;  %v1812_v54 = vpack.c.bf16 %v261_v45, %v260_v44  ;;  %v316_v39 = vld [vmem:[%s3121_s1 + $0x620] sm:$0xff]  ;;  %v334_v44 = vld [vmem:[%s3121_s1 + $0x6b0] sm:$0xff]  ;;  %v335_v45 = vld [vmem:[%s3121_s1 + $0x6b8] sm:$0xff] }
  0x4a   :  { %1795 = vmatprep.subr.bf16.mxu0 %v1794_v57  ;;  %v262_v57 = vld [vmem:[%s3121_s1 + $0x470] sm:$0xff]  ;;  %v1860_v49 = vpack.c.bf16 %v317_v40, %v316_v39  ;;  %v319_v53 = vld [vmem:[%s3121_s1 + $0x638] sm:$0xff]  ;;  %v320_v1 = vld [vmem:[%s3121_s1 + $0x640] sm:$0xff] }
  0x4b   :  { %1825 = vmatpush3.bf16.msra.mxu1 %v1824_v56  ;;  %v1814_v56 = vpack.c.bf16 %v279_v51, %v278_v50  ;;  %v1816_v3 = vpack.c.bf16 %v263_v58, %v262_v57  ;;  %v366_v46 = vld [vmem:[%s3121_s1 + $0x7b0] sm:$0xff]  ;;  %v1862_v51 = vpack.c.bf16 %v335_v45, %v334_v44  ;;  %v336_v57 = vld [vmem:[%s3121_s1 + $0x6c0] sm:$0xff]  ;;  %v337_v58 = vld [vmem:[%s3121_s1 + $0x6c8] sm:$0xff] }
  0x4c   :  { %1827 = vmatprep.subr.bf16.mxu1 %v1826_v62  ;;  %v295_v62 = vld [vmem:[%s3121_s1 + $0x578] sm:$0xff]  ;;  %v318_v52 = vld [vmem:[%s3121_s1 + $0x630] sm:$0xff]  ;;  %v1866_v0 = vpack.c.bf16 %v337_v58, %v336_v57  ;;  %v321_v2 = vld [vmem:[%s3121_s1 + $0x648] sm:$0xff] }
  0x4d   :  { %1797 = vmatpush3.bf16.msra.mxu0 %v1796_v4  ;;  %v23_v4 = vadd.s32 1024, %v2143_v61  ;;  %v1848_v7 = vpack.c.bf16 %v295_v62, %v294_v59  ;;  %v368_v59 = vld [vmem:[%s3121_s1 + $0x7c0] sm:$0xff]  ;;  %v1864_v62 = vpack.c.bf16 %v319_v53, %v318_v52  ;;  %v323_v14 = vld [vmem:[%s3121_s1 + $0x658] sm:$0xff]  ;;  %v373_v21 = vld [vmem:[%s3121_s1 + $0x7e8] sm:$0xff] }
  0x4e   :  { %1799 = vmatprep.subr.bf16.mxu0 %v1798_v6  ;;  %v312_v6 = vld [vmem:[%s3121_s1 + $0x600] sm:$0xff]  ;;  %v325_v26 = vld [vmem:[%s3121_s1 + $0x668] sm:$0xff]  ;;  %v343_v32 = vld [vmem:[%s3121_s1 + $0x6f8] sm:$0xff] }
  0x4f   :  { %1829 = vmatpush3.bf16.msra.mxu1 %v1828_v5  ;;  %v43_v5 = vld [vmem:[%s3122_s0 + $0x40] sm:$0xff]  ;;  %v1852_v20 = vpack.c.bf16 %v313_v9, %v312_v6  ;;  %v338_v6 = vld [vmem:[%s3121_s1 + $0x6d0] sm:$0xff]  ;;  %v371_v9 = vld [vmem:[%s3121_s1 + $0x7d8] sm:$0xff] }
  0x50   :  { %1831 = vmatprep.subr.bf16.mxu1 %v1830_v10  ;;  %v25_v10 = vadd.s32 1280, %v2143_v61  ;;  %vm63_vm10 = vcmp.eq.s32.totalorder %v23_v4, %v43_v5  ;;  %v353_v5 = vld [vmem:[%s3121_s1 + $0x748] sm:$0xff]  ;;  %v374_v33 = vld [vmem:[%s3121_s1 + $0x7f0] sm:$0xff]  ;;  %v327_v39 = vld [vmem:[%s3121_s1 + $0x678] sm:$0xff] }
  0x51   :  { %1801 = vmatpush3.bf16.msra.mxu0 %v1800_v16  ;;  %v331_v16 = vld [vmem:[%s3121_s1 + $0x698] sm:$0xff]  ;;  %v358_v40 = vld [vmem:[%s3121_s1 + $0x770] sm:$0xff]  ;;  %v393_v44 = vld [vmem:[%s3121_s1 + $0x888] sm:$0xff] }
  0x52   :  { %1803 = vmatprep.subr.bf16.mxu0 %v1802_v18  ;;  %v363_v18 = vld [vmem:[%s3121_s1 + $0x798] sm:$0xff]  ;;  %vm65_vm11 = vcmp.eq.s32.totalorder %v25_v10, %v45_v11  ;;  %v1854_v25 = vpack.c.bf16 %v331_v16, %v330_v15  ;;  %v1868_v10 = vpack.c.bf16 %v321_v2, %v320_v1  ;;  %v354_v15 = vld [vmem:[%s3121_s1 + $0x750] sm:$0xff]  ;;  %v424_v45 = vld [vmem:[%s3121_s1 + $0x980] sm:$0xff]  ;;  %v32_v1 = vadd.s32 2176, %v2143_v61 }
  0x53   :  { %1833 = vmatpush3.bf16.msra.mxu1 %v1832_v17  ;;  %v362_v17 = vld [vmem:[%s3121_s1 + $0x790] sm:$0xff]  ;;  %v408_v57 = vld [vmem:[%s3121_s1 + $0x900] sm:$0xff] }
  0x54   :  { %1835 = vmatprep.subr.bf16.mxu1 %v1834_v22  ;;  %v48_v22 = vld [vmem:[%s3122_s0 + $0x68] sm:$0xff] }
  0x55   :  { %1805 = vmatpush3.bf16.msra.mxu0 %v1804_v29  ;;  %v50_v29 = vld [vmem:[%s3122_s0 + $0x78] sm:$0xff]  ;;  %vm68_vm12 = vcmp.eq.s32.totalorder %v28_v19, %v48_v22  ;;  %v341_v19 = vld [vmem:[%s3121_s1 + $0x6e8] sm:$0xff] }
  0x56   :  { %1807 = vmatprep.subr.bf16.mxu0 %v1806_v31  ;;  %v347_v31 = vld [vmem:[%s3121_s1 + $0x718] sm:$0xff]  ;;  %vm70_vm13 = vcmp.eq.s32.totalorder %v30_v23, %v50_v29 }
  0x57   :  { %1837 = vmatpush3.bf16.msra.mxu1 %v1836_v30  ;;  %v1886_v30 = vpack.c.bf16 %v363_v18, %v362_v17  ;;  %v1888_v37 = vpack.c.bf16 %v347_v31, %v346_v27  ;;  %v355_v17 = vld [vmem:[%s3121_s1 + $0x758] sm:$0xff]  ;;  %v340_v18 = vld [vmem:[%s3121_s1 + $0x6e0] sm:$0xff]  ;;  %v342_v31 = vld [vmem:[%s3121_s1 + $0x6f0] sm:$0xff] }
  0x58   :  { %1839 = vmatprep.subr.bf16.mxu1 %v1838_v35  ;;  %v365_v35 = vld [vmem:[%s3121_s1 + $0x7a8] sm:$0xff]  ;;  %v1904_v23 = vpack.c.bf16 %v355_v17, %v354_v15  ;;  %v356_v27 = vld [vmem:[%s3121_s1 + $0x760] sm:$0xff] }
  0x59   :  { %1809 = vmatpush3.bf16.msra.mxu0 %v1808_v41  ;;  %v348_v41 = vld [vmem:[%s3121_s1 + $0x720] sm:$0xff] }
  0x5a   :  { %1811 = vmatprep.subr.bf16.mxu0 %v1810_v43  ;;  %v349_v43 = vld [vmem:[%s3121_s1 + $0x728] sm:$0xff]  ;;  %v428_v15 = vld [vmem:[%s3121_s1 + $0x9a0] sm:$0xff] }
  0x5b   :  { %1841 = vmatpush3.bf16.msra.mxu1 %v1840_v42  ;;  %v1890_v42 = vpack.c.bf16 %v365_v35, %v364_v34  ;;  %v1892_v50 = vpack.c.bf16 %v349_v43, %v348_v41  ;;  %v375_v34 = vld [vmem:[%s3121_s1 + $0x7f8] sm:$0xff]  ;;  %v392_v43 = vld [vmem:[%s3121_s1 + $0x880] sm:$0xff] }
  0x5c   :  { %1843 = vmatprep.subr.bf16.mxu1 %v1842_v48  ;;  %v367_v48 = vld [vmem:[%s3121_s1 + $0x7b8] sm:$0xff]  ;;  %v1910_v41 = vpack.c.bf16 %v375_v34, %v374_v33  ;;  %v1914_v53 = vpack.c.bf16 %v393_v44, %v392_v43  ;;  %v382_v33 = vld [vmem:[%s3121_s1 + $0x830] sm:$0xff] }
  0x5d   :  { %1813 = vmatpush3.bf16.msra.mxu0 %v1812_v54  ;;  %v350_v54 = vld [vmem:[%s3121_s1 + $0x730] sm:$0xff]  ;;  %v383_v34 = vld [vmem:[%s3121_s1 + $0x838] sm:$0xff] }
  0x5e   :  { %1815 = vmatprep.subr.bf16.mxu0 %v1814_v56  ;;  %v351_v56 = vld [vmem:[%s3121_s1 + $0x738] sm:$0xff] }
  0x5f   :  { %1845 = vmatpush3.bf16.msra.mxu1 %v1844_v55  ;;  %v1894_v55 = vpack.c.bf16 %v367_v48, %v366_v46  ;;  %v1896_v63 = vpack.c.bf16 %v351_v56, %v350_v54  ;;  %v425_v46 = vld [vmem:[%s3121_s1 + $0x988] sm:$0xff]  ;;  %v49_v56 = vld [vmem:[%s3122_s0 + $0x70] sm:$0xff] }
  0x60   :  { %1847 = vmatprep.subr.bf16.mxu1 %v1846_v60  ;;  %v369_v60 = vld [vmem:[%s3121_s1 + $0x7c8] sm:$0xff]  ;;  %v1946_v58 = vpack.c.bf16 %v425_v46, %v424_v45  ;;  %v384_v45 = vld [vmem:[%s3121_s1 + $0x840] sm:$0xff] }
  0x61   :  { %1817 = vmatpush3.bf16.msra.mxu0 %v1816_v3  ;;  %v352_v3 = vld [vmem:[%s3121_s1 + $0x740] sm:$0xff]  ;;  %v1898_v4 = vpack.c.bf16 %v369_v60, %v368_v59  ;;  %v377_v54 = vld [vmem:[%s3121_s1 + $0x808] sm:$0xff]  ;;  %v394_v60 = vld [vmem:[%s3121_s1 + $0x890] sm:$0xff] }
  0x62   :  { %1851 = vmatprep.subr.bf16.mxu0 %v1850_v8  ;;  %v370_v8 = vld [vmem:[%s3121_s1 + $0x7d0] sm:$0xff]  ;;  %v1900_v11 = vpack.c.bf16 %v353_v5, %v352_v3  ;;  %v409_v59 = vld [vmem:[%s3121_s1 + $0x908] sm:$0xff]  ;;  %v34_v5 = vadd.s32 2432, %v2143_v61 }
  0x63   :  { %1849 = vmatpush3.bf16.msra.mxu1 %v1848_v7  ;;  %v339_v7 = vld [vmem:[%s3121_s1 + $0x6d8] sm:$0xff]  ;;  %v1902_v16 = vpack.c.bf16 %v371_v9, %v370_v8  ;;  %v378_v3 = vld [vmem:[%s3121_s1 + $0x810] sm:$0xff]  ;;  %v385_v46 = vld [vmem:[%s3121_s1 + $0x848] sm:$0xff] }
  0x64   :  { %1883 = vmatprep.subr.bf16.mxu1 %v1882_v13  ;;  %1279 = vmatmul.mubr.msk.f32.vlgmr.msra.gmra.mrb[4].mxu0 %vm63_vm10, %v1992_v28  ;;  %v1870_v12 = vpack.c.bf16 %v339_v7, %v338_v6  ;;  %v322_v13 = vld [vmem:[%s3121_s1 + $0x650] sm:$0xff]  ;;  %v1948_v6 = vpack.c.bf16 %v409_v59, %v408_v57  ;;  %v379_v8 = vld [vmem:[%s3121_s1 + $0x818] sm:$0xff] }
  0x65   :  { %1853 = vmatpush3.bf16.msra.mxu0 %v1852_v20  ;;  %1282 = vmatprep.mubr.msk.f32.mxu0 %vm68_vm12, %v1992_v28  ;;  %v372_v20 = vld [vmem:[%s3121_s1 + $0x7e0] sm:$0xff]  ;;  %v1872_v22 = vpack.c.bf16 %v323_v14, %v322_v13  ;;  %v410_v9 = vld [vmem:[%s3121_s1 + $0x910] sm:$0xff]  ;;  %v397_v14 = vld [vmem:[%s3121_s1 + $0x8a8] sm:$0xff]  ;;  %v1920_v17 = vpack.c.bf16 %v379_v8, %v378_v3 }
  0x66   :  { %1281 = vmatmul.mubr.msk.f32.vlgmr.msra.gmra.mrb[4].mxu1 %vm65_vm11, %v1992_v28  ;;  %1855 = vmatprep.subr.bf16.mxu0 %v1854_v25  ;;  %v324_v25 = vld [vmem:[%s3121_s1 + $0x660] sm:$0xff]  ;;  %v1906_v29 = vpack.c.bf16 %v373_v21, %v372_v20  ;;  %v381_v21 = vld [vmem:[%s3121_s1 + $0x828] sm:$0xff]  ;;  %v387_v59 = vld [vmem:[%s3121_s1 + $0x858] sm:$0xff] }
  0x67   :  { %1885 = vmatpush3.bf16.msra.mxu1 %v1884_v24  ;;  %1284 = vmatprep.mubr.msk.f32.mxu1 %vm70_vm13, %v1992_v28  ;;  %v1874_v24 = vpack.c.bf16 %v341_v19, %v340_v18  ;;  %v1876_v35 = vpack.c.bf16 %v325_v26, %v324_v25  ;;  %v396_v13 = vld [vmem:[%s3121_s1 + $0x8a0] sm:$0xff]  ;;  %v398_v25 = vld [vmem:[%s3121_s1 + $0x8b0] sm:$0xff]  ;;  %v399_v26 = vld [vmem:[%s3121_s1 + $0x8b8] sm:$0xff] }
  0x68   :  { %1887 = vmatprep.subr.bf16.mxu1 %v1886_v30  ;;  %v357_v30 = vld [vmem:[%s3121_s1 + $0x768] sm:$0xff]  ;;  %v1922_v19 = vpack.c.bf16 %v397_v14, %v396_v13  ;;  %v380_v20 = vld [vmem:[%s3121_s1 + $0x820] sm:$0xff]  ;;  %v407_v13 = vld [vmem:[%s3121_s1 + $0x8f8] sm:$0xff] }
  0x69   :  { %1857 = vmatpush3.bf16.msra.mxu0 %v1856_v36  ;;  %v1908_v36 = vpack.c.bf16 %v357_v30, %v356_v27  ;;  %v430_v27 = vld [vmem:[%s3121_s1 + $0x9b0] sm:$0xff]  ;;  %v1924_v30 = vpack.c.bf16 %v381_v21, %v380_v20  ;;  %v437_v3 = vld [vmem:[%s3121_s1 + $0x9e8] sm:$0xff]  ;;  %v391_v20 = vld [vmem:[%s3121_s1 + $0x878] sm:$0xff] }
  0x6a   :  { %1859 = vmatprep.subr.bf16.mxu0 %v1858_v38  ;;  %v326_v38 = vld [vmem:[%s3121_s1 + $0x670] sm:$0xff]  ;;  %v389_v8 = vld [vmem:[%s3121_s1 + $0x868] sm:$0xff] }
  0x6b   :  { %1889 = vmatpush3.bf16.msra.mxu1 %v1888_v37  ;;  %v1878_v37 = vpack.c.bf16 %v343_v32, %v342_v31  ;;  %v1880_v48 = vpack.c.bf16 %v327_v39, %v326_v38  ;;  %v1926_v32 = vpack.c.bf16 %v399_v26, %v398_v25  ;;  %v400_v38 = vld [vmem:[%s3121_s1 + $0x8c0] sm:$0xff]  ;;  %v401_v39 = vld [vmem:[%s3121_s1 + $0x8c8] sm:$0xff]  ;;  %v438_v14 = vld [vmem:[%s3121_s1 + $0x9f0] sm:$0xff]  ;;  %v31_v25 = vadd.s32 2048, %v2143_v61 }
  0x6c   :  { %1891 = vmatprep.subr.bf16.mxu1 %v1890_v42  ;;  %v359_v42 = vld [vmem:[%s3121_s1 + $0x778] sm:$0xff]  ;;  %v1930_v44 = vpack.c.bf16 %v401_v39, %v400_v38 }
  0x6d   :  { %1861 = vmatpush3.bf16.msra.mxu0 %v1860_v49  ;;  %v27_v49 = vadd.s32 1536, %v2143_v61  ;;  %v1912_v52 = vpack.c.bf16 %v359_v42, %v358_v40  ;;  %v432_v40 = vld [vmem:[%s3121_s1 + $0x9c0] sm:$0xff]  ;;  %v1928_v42 = vpack.c.bf16 %v383_v34, %v382_v33 }
  0x6e   :  { %1863 = vmatprep.subr.bf16.mxu0 %v1862_v51  ;;  %v376_v51 = vld [vmem:[%s3121_s1 + $0x800] sm:$0xff] }
  0x6f   :  { %1893 = vmatpush3.bf16.msra.mxu1 %v1892_v50  ;;  %v47_v50 = vld [vmem:[%s3122_s0 + $0x60] sm:$0xff]  ;;  %v1916_v2 = vpack.c.bf16 %v377_v54, %v376_v51  ;;  %v402_v51 = vld [vmem:[%s3121_s1 + $0x8d0] sm:$0xff]  ;;  %v435_v54 = vld [vmem:[%s3121_s1 + $0x9d8] sm:$0xff] }
  0x70   :  { %1895 = vmatprep.subr.bf16.mxu1 %v1894_v55  ;;  %v29_v55 = vadd.s32 1792, %v2143_v61  ;;  %vm67_vm14 = vcmp.eq.s32.totalorder %v27_v49, %v47_v50  ;;  %v417_v50 = vld [vmem:[%s3121_s1 + $0x948] sm:$0xff] }
  0x71   :  { %1865 = vmatpush3.bf16.msra.mxu0 %v1864_v62  ;;  %v395_v62 = vld [vmem:[%s3121_s1 + $0x898] sm:$0xff] }
  0x72   :  { %1867 = vmatprep.subr.bf16.mxu0 %v1866_v0  ;;  %v427_v0 = vld [vmem:[%s3121_s1 + $0x998] sm:$0xff]  ;;  %vm69_vm15 = vcmp.eq.s32.totalorder %v29_v55, %v49_v56  ;;  %v1918_v7 = vpack.c.bf16 %v395_v62, %v394_v60  ;;  %v1932_v55 = vpack.c.bf16 %v385_v46, %v384_v45  ;;  %v418_v60 = vld [vmem:[%s3121_s1 + $0x950] sm:$0xff] }
  0x73   :  { %1897 = vmatpush3.bf16.msra.mxu1 %v1896_v63  ;;  %v426_v63 = vld [vmem:[%s3121_s1 + $0x990] sm:$0xff] }
  0x74   :  { %1899 = vmatprep.subr.bf16.mxu1 %v1898_v4  ;;  %v52_v4 = vld [vmem:[%s3122_s0 + $0x88] sm:$0xff] }
  0x75   :  { %1869 = vmatpush3.bf16.msra.mxu0 %v1868_v10  ;;  %v54_v10 = vld [vmem:[%s3122_s0 + $0x98] sm:$0xff]  ;;  %vm72_vm0 = vcmp.eq.s32.totalorder %v32_v1, %v52_v4  ;;  %v405_v1 = vld [vmem:[%s3121_s1 + $0x8e8] sm:$0xff] }
  0x76   :  { %1871 = vmatprep.subr.bf16.mxu0 %v1870_v12  ;;  %v411_v12 = vld [vmem:[%s3121_s1 + $0x918] sm:$0xff]  ;;  %vm74_vm1 = vcmp.eq.s32.totalorder %v34_v5, %v54_v10 }
  0x77   :  { %1901 = vmatpush3.bf16.msra.mxu1 %v1900_v11  ;;  %v1950_v11 = vpack.c.bf16 %v427_v0, %v426_v63  ;;  %v1952_v18 = vpack.c.bf16 %v411_v12, %v410_v9  ;;  %v419_v63 = vld [vmem:[%s3121_s1 + $0x958] sm:$0xff]  ;;  %v404_v0 = vld [vmem:[%s3121_s1 + $0x8e0] sm:$0xff]  ;;  %v406_v12 = vld [vmem:[%s3121_s1 + $0x8f0] sm:$0xff] }
  0x78   :  { %1903 = vmatprep.subr.bf16.mxu1 %v1902_v16  ;;  %v429_v16 = vld [vmem:[%s3121_s1 + $0x9a8] sm:$0xff]  ;;  %v1968_v5 = vpack.c.bf16 %v419_v63, %v418_v60  ;;  %v420_v9 = vld [vmem:[%s3121_s1 + $0x960] sm:$0xff] }
  0x79   :  { %1873 = vmatpush3.bf16.msra.mxu0 %v1872_v22  ;;  %v412_v22 = vld [vmem:[%s3121_s1 + $0x920] sm:$0xff] }
  0x7a   :  { %1875 = vmatprep.subr.bf16.mxu0 %v1874_v24  ;;  %v413_v24 = vld [vmem:[%s3121_s1 + $0x928] sm:$0xff] }
  0x7b   :  { %1905 = vmatpush3.bf16.msra.mxu1 %v1904_v23  ;;  %v1954_v23 = vpack.c.bf16 %v429_v16, %v428_v15  ;;  %v1956_v31 = vpack.c.bf16 %v413_v24, %v412_v22  ;;  %v439_v15 = vld [vmem:[%s3121_s1 + $0x9f8] sm:$0xff]  ;;  %v422_v22 = vld [vmem:[%s3121_s1 + $0x970] sm:$0xff] }
  0x7c   :  { %1907 = vmatprep.subr.bf16.mxu1 %v1906_v29  ;;  %v431_v29 = vld [vmem:[%s3121_s1 + $0x9b8] sm:$0xff]  ;;  %v1974_v21 = vpack.c.bf16 %v439_v15, %v438_v14 }
  0x7d   :  { %1877 = vmatpush3.bf16.msra.mxu0 %v1876_v35  ;;  %v414_v35 = vld [vmem:[%s3121_s1 + $0x930] sm:$0xff] }
  0x7e   :  { %1879 = vmatprep.subr.bf16.mxu0 %v1878_v37  ;;  %v415_v37 = vld [vmem:[%s3121_s1 + $0x938] sm:$0xff] }
  0x7f   :  { %1909 = vmatpush3.bf16.msra.mxu1 %v1908_v36  ;;  %v1958_v36 = vpack.c.bf16 %v431_v29, %v430_v27  ;;  %v1960_v43 = vpack.c.bf16 %v415_v37, %v414_v35  ;;  %v51_v27 = vld [vmem:[%s3122_s0 + $0x80] sm:$0xff]  ;;  %v33_v29 = vadd.s32 2304, %v2143_v61 }
  0x80   :  { %1911 = vmatprep.subr.bf16.mxu1 %v1910_v41  ;;  %v433_v41 = vld [vmem:[%s3121_s1 + $0x9c8] sm:$0xff]  ;;  %vm71_vm2 = vcmp.eq.s32.totalorder %v31_v25, %v51_v27  ;;  %v3097_v61 = vld [vmem:[%s3123_s2 + $0x20] sm:$0xf] }
  0x81   :  { %1881 = vmatpush3.bf16.msra.mxu0 %v1880_v48  ;;  %v416_v48 = vld [vmem:[%s3121_s1 + $0x940] sm:$0xff]  ;;  %v1962_v49 = vpack.c.bf16 %v433_v41, %v432_v40  ;;  %v1993_v40 = vmov 0.0|0.0  }
  0x82   :  { %1915 = vmatprep.subr.bf16.mxu0 %v1914_v53  ;;  %v434_v53 = vld [vmem:[%s3121_s1 + $0x9d0] sm:$0xff]  ;;  %v1964_v56 = vpack.c.bf16 %v417_v50, %v416_v48  ;;  %v115_v35 = vld [vmem:[%s3123_s2] sm:$0xff]  ;;  %v1995_v48 = vmov 0.0  }
  0x83   :  { %1913 = vmatpush3.bf16.msra.mxu1 %v1912_v52  ;;  %v403_v52 = vld [vmem:[%s3121_s1 + $0x8d8] sm:$0xff]  ;;  %v1966_v62 = vpack.c.bf16 %v435_v54, %v434_v53 }
  0x84   :  { %1947 = vmatprep.subr.bf16.mxu1 %v1946_v58  ;;  %1283 = vmatmul.mubr.msk.f32.vlgmr.msra.gmra.mrb[6].mxu0 %vm67_vm14, %v1992_v28  ;;  %v1934_v57 = vpack.c.bf16 %v403_v52, %v402_v51  ;;  %v386_v58 = vld [vmem:[%s3121_s1 + $0x850] sm:$0xff] }
  0x85   :  { %1917 = vmatpush3.bf16.msra.mxu0 %v1916_v2  ;;  %1286 = vmatprep.mubr.msk.f32.mxu0 %vm72_vm0, %v1992_v28  ;;  %v436_v2 = vld [vmem:[%s3121_s1 + $0x9e0] sm:$0xff]  ;;  %v1936_v4 = vpack.c.bf16 %v387_v59, %v386_v58 }
  0x86   :  { %1285 = vmatmul.mubr.msk.f32.vlgmr.msra.gmra.mrb[6].mxu1 %vm69_vm15, %v1992_v28  ;;  %1919 = vmatprep.subr.bf16.mxu0 %v1918_v7  ;;  %v388_v7 = vld [vmem:[%s3121_s1 + $0x860] sm:$0xff]  ;;  %v1970_v10 = vpack.c.bf16 %v437_v3, %v436_v2 }
  0x87   :  { %1949 = vmatpush3.bf16.msra.mxu1 %v1948_v6  ;;  %1288 = vmatprep.mubr.msk.f32.mxu1 %vm74_vm1, %v1992_v28  ;;  %v1938_v6 = vpack.c.bf16 %v405_v1, %v404_v0  ;;  %v1940_v16 = vpack.c.bf16 %v389_v8, %v388_v7 }
  0x88   :  { %1951 = vmatprep.subr.bf16.mxu1 %v1950_v11  ;;  %v421_v11 = vld [vmem:[%s3121_s1 + $0x968] sm:$0xff] }
  0x89   :  { %1921 = vmatpush3.bf16.msra.mxu0 %v1920_v17  ;;  %v1972_v17 = vpack.c.bf16 %v421_v11, %v420_v9 }
  0x8a   :  { %1923 = vmatprep.subr.bf16.mxu0 %v1922_v19  ;;  %v390_v19 = vld [vmem:[%s3121_s1 + $0x870] sm:$0xff] }
  0x8b   :  { %1953 = vmatpush3.bf16.msra.mxu1 %v1952_v18  ;;  %v1942_v18 = vpack.c.bf16 %v407_v13, %v406_v12  ;;  %v1944_v24 = vpack.c.bf16 %v391_v20, %v390_v19 }
  0x8c   :  { %1955 = vmatprep.subr.bf16.mxu1 %v1954_v23  ;;  %v423_v23 = vld [vmem:[%s3121_s1 + $0x978] sm:$0xff] }
  0x8d   :  { %1925 = vmatpush3.bf16.msra.mxu0 %v1924_v30  ;;  %v1976_v26 = vpack.c.bf16 %v423_v23, %v422_v22  ;;  %v53_v30 = vld [vmem:[%s3122_s0 + $0x90] sm:$0xff] }
  0x8e   :  { %1927 = vmatprep.subr.bf16.mxu0 %v1926_v32  ;;  %vm73_vm3 = vcmp.eq.s32.totalorder %v33_v29, %v53_v30 }
  0x8f   :  { %1957 = vmatpush3.bf16.msra.mxu1 %v1956_v31  ;;  %v3091_v31 = vshrl.u32 %v14_v47, 7 }
  0x90   :  { %1959 = vmatprep.subr.bf16.mxu1 %v1958_v36 }
  0x91   :  { %1929 = vmatpush3.bf16.msra.mxu0 %v1928_v42  ;;  %v442_v32 = vsub.s32 0, %v3091_v31  ;;  %v1147_v19 = vsub.s32 1, %v3091_v31  ;;  %v1235_v30 = vsub.s32 3, %v3091_v31 }
  0x92   :  { %1931 = vmatprep.subr.bf16.mxu0 %v1930_v44  ;;  %v118_v44 = vld [vmem:[%s3123_s2 + $0x18] sm:$0xff] }
  0x93   :  { %1961 = vmatpush3.bf16.msra.mxu1 %v1960_v43  ;;  %v443_v34 = vrot.slane %v3097_v61, %v442_v32  ;;  %v117_v43 = vld [vmem:[%s3123_s2 + $0x10] sm:$0xff]  ;;  %v1148_v20 = vrot.slane %v3097_v61, %v1147_v19  ;;  %v1236_v32 = vrot.slane %v3097_v61, %v1235_v30 }
  0x94   :  { %1963 = vmatprep.subr.bf16.mxu1 %v1962_v49  ;;  %v1982_v45 = vpack.c.bf16 %v118_v44, %v117_v43 }
  0x95   :  { %1933 = vmatpush3.bf16.msra.mxu0 %v1932_v55 }
  0x96   :  { %1935 = vmatprep.subr.bf16.mxu0 %v1934_v57 }
  0x97   :  { %1965 = vmatpush3.bf16.msra.mxu1 %v1964_v56 }
  0x98   :  { %1967 = vmatprep.subr.bf16.mxu1 %v1966_v62 }
  0x99   :  { %1937 = vmatpush3.bf16.msra.mxu0 %v1936_v4 }
  0x9a   :  { %1939 = vmatprep.subr.bf16.mxu0 %v1938_v6 }
  0x9b   :  { %1969 = vmatpush3.bf16.msra.mxu1 %v1968_v5 }
  0x9c   :  { %1971 = vmatprep.subr.bf16.mxu1 %v1970_v10 }
  0x9d   :  { %1941 = vmatpush3.bf16.msra.mxu0 %v1940_v16 }
  0x9e   :  { %1943 = vmatprep.subr.bf16.mxu0 %v1942_v18 }
  0x9f   :  { %1973 = vmatpush3.bf16.msra.mxu1 %v1972_v17 }
  0xa0   :  { %1975 = vmatprep.subr.bf16.mxu1 %v1974_v21  ;;  %v1226_v21 = vsub.s32 2, %v3091_v31 }
  0xa1   :  { %1945 = vmatpush3.bf16.msra.mxu0 %v1944_v24 }
  0xa2   :  { %1978 = vmatprep.subr.bf16.mxu0 %v1993_v40  ;;  %v1227_v25 = vrot.slane %v3097_v61, %v1226_v21 }
  0xa3   :  { %1977 = vmatpush3.bf16.msra.mxu1 %v1976_v26 }
  0xa4   :  { %1287 = vmatmul.mubr.msk.f32.vlgmr.msra.gmra.mrb[8].mxu0 %vm71_vm2, %v1992_v28 }
  0xa5   :  { %1655 = vmatprep.mubr.msk.f32.mxu0 %vm1994_vm4, %v1995_v48 }
  0xa6   :  { %1289 = vmatmul.mubr.msk.f32.vlgmr.msra.gmra.mrb[8].mxu1 %vm73_vm3, %v1992_v28  ;;  %v116_v28 = vld [vmem:[%s3123_s2 + $0x8] sm:$0xff] }
  0xa7   :  { %v1979_v37 = vpack.c.bf16 %v116_v28, %v115_v35 }
  0xa9   :  { %1980 = vmatpush3.bf16.msra.mxu0 %v1979_v37 }
  0xaa   :  { %1981 = vmatprep.subr.bf16.mxu0 %v1993_v40 }
  0xad   :  { %1983 = vmatpush3.bf16.msra.mxu0 %v1982_v45 }
  0xf7   :  { %v1324_v33 = vpop.f32.mrb[0].mxu0 }
  0xf8   :  { %v1325_v47 = vpop.f32.mrb[1].mxu0 }
  0xf9   :  { %v1359_v36 = vpop.f32.mrb[0].mxu1  ;;  %v1326_v38 = vadd.f32 %v1325_v47, %v1324_v33 }
  0xfa   :  { %v1360_v39 = vpop.f32.mrb[1].mxu1 }
  0xfb   :  { %v1361_v41 = vadd.f32 %v1360_v39, %v1359_v36  ;;  %v511_v42 = vadd.f32 %v1326_v38, %v443_v34 }
  0xfd   :  { %v581_v46 = vadd.f32 %v1361_v41, %v511_v42 }
 0x117   :  { %v1394_v49 = vpop.f32.mrb[2].mxu0 }
 0x118   :  { %v1395_v50 = vpop.f32.mrb[3].mxu0 }
 0x119   :  { %v1429_v51 = vpop.f32.mrb[2].mxu1  ;;  %v1396_v52 = vadd.f32 %v1395_v50, %v1394_v49 }
 0x11a   :  { %v1430_v53 = vpop.f32.mrb[3].mxu1 }
 0x11b   :  { %v1431_v54 = vadd.f32 %v1430_v53, %v1429_v51  ;;  %v651_v55 = vadd.f32 %v1396_v52, %v581_v46 }
 0x11d   :  { %v721_v56 = vadd.f32 %v1431_v54, %v651_v55 }
 0x137   :  { %v1464_v57 = vpop.f32.mrb[4].mxu0 }
 0x138   :  { %v1465_v58 = vpop.f32.mrb[5].mxu0 }
 0x139   :  { %v1499_v59 = vpop.f32.mrb[4].mxu1  ;;  %v1466_v60 = vadd.f32 %v1465_v58, %v1464_v57 }
 0x13a   :  { %v1500_v62 = vpop.f32.mrb[5].mxu1 }
 0x13b   :  { %v1501_v63 = vadd.f32 %v1500_v62, %v1499_v59  ;;  %v791_v0 = vadd.f32 %v1466_v60, %v721_v56 }
 0x13d   :  { %v861_v1 = vadd.f32 %v1501_v63, %v791_v0 }
 0x157   :  { %v1534_v2 = vpop.f32.mrb[6].mxu0 }
 0x158   :  { %v1535_v3 = vpop.f32.mrb[7].mxu0 }
 0x159   :  { %v1569_v4 = vpop.f32.mrb[6].mxu1  ;;  %v1536_v5 = vadd.f32 %v1535_v3, %v1534_v2 }
 0x15a   :  { %v1570_v6 = vpop.f32.mrb[7].mxu1 }
 0x15b   :  { %v1571_v7 = vadd.f32 %v1570_v6, %v1569_v4  ;;  %v931_v8 = vadd.f32 %v1536_v5, %v861_v1 }
 0x15d   :  { %v1001_v9 = vadd.f32 %v1571_v7, %v931_v8 }
 0x177   :  { %v1604_v10 = vpop.f32.mrb[8].mxu0 }
 0x178   :  { %v1605_v11 = vpop.f32.mrb[9].mxu0 }
 0x179   :  { %v1639_v12 = vpop.f32.mrb[8].mxu1  ;;  %v1606_v13 = vadd.f32 %v1605_v11, %v1604_v10 }
 0x17a   :  { %v1640_v14 = vpop.f32.mrb[9].mxu1 }
 0x17b   :  { %v1641_v15 = vadd.f32 %v1640_v14, %v1639_v12  ;;  %v1071_v16 = vadd.f32 %v1606_v13, %v1001_v9 }
 0x17d   :  { %v1141_v17 = vadd.f32 %v1641_v15, %v1071_v16 }
 0x17f   :  { %v1144_v18 = vmax.f32 %v1141_v17, 0.0 }
 0x181   :  { %1656 = vmatmul.mubr.msk.f32.vlgmr.msra.gmra.mrb[10].mxu0 %vm1149_vm5, %v1144_v18 }
 0x254   :  { %v1219_v22 = vpop.f32.mrb[10].mxu0 }
 0x255   :  { %v1220_v23 = vadd.f32 %v1219_v22, %v1148_v20  ;;  %v1657_v24 = vpop.f32.mrb[11].mxu0 }
 0x257   :  { %v1223_v26 = vmax.f32 %v1220_v23, 0.0 }
 0x259   :  { %v1228_v27 = vmul.f32 %v1227_v25, %v1223_v26 }
 0x25b   :  { %v1230_v29 = vsel %vm1229_vm6, %v1228_v27, 0.0 }
 0x25c   :  { %1231 = vadd.xlane.f32.xlu0 %v1230_v29 }
 0x2e9   :  { %v1232_v33 = vpop.xlane.xlu0 %1231 }
 0x2ea   :  { %v1237_v34 = vadd.f32 %v1236_v32, %v1232_v33 }
 0x2ec   :  { %v1291_v35 = vmul.f32 -1.442695, %v1237_v34 }
 0x2ee   :  { %1988 = vpow2.f32 %v1291_v35 }
 0x2f8   :  { %v1989_v28 = vpop.eup %1988 }
 0x2f9   :  { %v1241_v47 = vadd.f32 1.0, %v1989_v28 }
 0x2fb   :  { %1990 = vrcp.f32 %v1241_v47 }
 0x305   :  { %v1991_v36 = vpop.eup %1990 }
 0x306   :  { %1245 = vst.msk [vmem:[%s3124_s3] sm:$0xff] %vm1244_vm7, %v1991_v36 }

</bundles_post_ra>
